<compile_context>
chip_gen: v7x
topology: tpu7x:2x2x1
jax: 0.10.0
libtpu: 0.0.40
codegen_flags: <defaults>
</compile_context>

<pallas_src>
import functools

import jax
import jax.numpy as jnp
from jax.experimental import pallas as pl
from jax.experimental.pallas import tpu as pltpu


N_IN = 28 * 28      # 784
N_HID = 128
N_OUT = 10


def _round_up(n, m):
    return ((n + m - 1) // m) * m


def mlp_kernel(x_ref, w1_ref, b1_ref, w2_ref, b2_ref, o_ref):
    # In-kernel f32 -> bf16 cast: x streams from HBM exactly once (f32); the
    # VPU cast rides under the MXU.
    x_bf = x_ref[...].astype(jnp.bfloat16)
    # fc1: (TB, 784)bf16 @ (784, 128)bf16 -> f32 accumulate on the MXU.
    h = jnp.dot(x_bf, w1_ref[...], preferred_element_type=jnp.float32)
    # Bias + ReLU in f32 on the VPU (keeps v5e off emulated-bf16 pointwise).
    h = jnp.maximum(h + b1_ref[...], 0.0)
    # fc2: narrow (128 -> 10) matmul, f32 accumulate; store straight into the
    # slim (TB, 10) f32 block (minimal HBM writeback).
    y = jnp.dot(h.astype(jnp.bfloat16), w2_ref[...],
                preferred_element_type=jnp.float32)
    o_ref[...] = y + b2_ref[...]


def prepare_params(w1_t, b1, w2_t, b2):
    """One-time weight prep, hoisted out of the per-call path.

    w1_t: (784, 128), b1: (128,), w2_t: (128, 10), b2: (10,)  ((in, out) layout
    so the kernel computes y = x @ W + b).
    """
    return (
        w1_t.astype(jnp.bfloat16),                     # MXU operand
        b1.reshape(1, N_HID).astype(jnp.float32),
        w2_t.astype(jnp.bfloat16),                     # MXU operand
        b2.reshape(1, N_OUT).astype(jnp.float32),
    )


@functools.partial(jax.jit, static_argnames=("batch_tile", "core_parallel"))
def simple_nn_forward(x_nchw, params, *, batch_tile=1024, core_parallel=False):
    """x_nchw: (B, 1, 28, 28) float32. Returns (B, 10) float32 logits."""
    w1_bf, b1_2d, w2_bf, b2_2d = params
    B = x_nchw.shape[0]
    x = x_nchw.reshape(B, N_IN)                        # x.view(-1, 784), f32

    # Batch tile: multiple of 8; floor so tiny batches run as a single step.
    tb = min(batch_tile, _round_up(B, 8))
    tb = _round_up(tb, 8)
    grid = (pl.cdiv(B, tb),)   # partial trailing block OK: rows independent,
                               # out-of-bounds output rows are never written.

    # v7x: pass core_parallel=True to shard grid steps across both TensorCores.
    semantics = (pltpu.CORE_PARALLEL,) if core_parallel else ("parallel",)

    return pl.pallas_call(
        mlp_kernel,
        out_shape=jax.ShapeDtypeStruct((B, N_OUT), jnp.float32),
        grid_spec=pltpu.PrefetchScalarGridSpec(
            num_scalar_prefetch=0,
            grid=grid,
            in_specs=[
                # x: tiled over batch -> pipelined (double-buffered) DMA.
                pl.BlockSpec((tb, N_IN), lambda i: (i, 0)),
                # Weights / biases: same block every step -> VMEM-resident.
                pl.BlockSpec((N_IN, N_HID), lambda i: (0, 0)),
                pl.BlockSpec((1, N_HID), lambda i: (0, 0)),
                pl.BlockSpec((N_HID, N_OUT), lambda i: (0, 0)),
                pl.BlockSpec((1, N_OUT), lambda i: (0, 0)),
            ],
            out_specs=pl.BlockSpec((tb, N_OUT), lambda i: (i, 0)),
        ),
        compiler_params=pltpu.CompilerParams(
            dimension_semantics=semantics,
            vmem_limit_bytes=32 * 1024 * 1024,
        ),
    )(x, w1_bf, b1_2d, w2_bf, b2_2d)


def init_params(key):
    """Deterministic init mimicking PyTorch Linear default (U(+/-1/sqrt(fan_in)))."""
    k1, k2, k3, k4 = jax.random.split(key, 4)
    bound1 = 1.0 / jnp.sqrt(float(N_IN))
    bound2 = 1.0 / jnp.sqrt(float(N_HID))
    # Stored already transposed: (in, out)
    w1_t = jax.random.uniform(k1, (N_IN, N_HID), jnp.float32, -bound1, bound1)
    b1 = jax.random.uniform(k2, (N_HID,), jnp.float32, -bound1, bound1)
    w2_t = jax.random.uniform(k3, (N_HID, N_OUT), jnp.float32, -bound2, bound2)
    b2 = jax.random.uniform(k4, (N_OUT,), jnp.float32, -bound2, bound2)
    return w1_t, b1, w2_t, b2


if __name__ == "__main__":
    key = jax.random.PRNGKey(0)
    kx, kp = jax.random.split(key)

    # Small batch; B deliberately NOT a multiple of the small tile so the
    # multi-step grid with a partial trailing block is exercised.
    B = 56
    x = jax.random.normal(kx, (B, 1, 28, 28), jnp.float32)   # NCHW like PyTorch
    w1_t, b1, w2_t, b2 = init_params(kp)
    params = prepare_params(w1_t, b1, w2_t, b2)

    # Multi-step grid path: 56 = 3*16 + 8 -> 4 grid steps, last one partial.
    logits_tiled = simple_nn_forward(x, params, batch_tile=16)
    # Default (single-step) path: tb floors to 56.
    logits = simple_nn_forward(x, params)
    logits, logits_tiled = jax.block_until_ready((logits, logits_tiled))
    assert logits.shape == (B, N_OUT)
    assert logits_tiled.shape == (B, N_OUT)

    # Reference with the same bf16-in / f32-accumulate recipe.
    x_flat = x.reshape(B, N_IN)
    h_ref = jnp.maximum(
        jnp.dot(x_flat.astype(jnp.bfloat16), w1_t.astype(jnp.bfloat16),
                preferred_element_type=jnp.float32) + b1, 0.0)
    ref = jnp.dot(h_ref.astype(jnp.bfloat16), w2_t.astype(jnp.bfloat16),
                  preferred_element_type=jnp.float32) + b2
    assert jnp.allclose(logits, ref, atol=1e-2, rtol=1e-2), (
        float(jnp.max(jnp.abs(logits - ref))))
    assert jnp.allclose(logits_tiled, ref, atol=1e-2, rtol=1e-2), (
        float(jnp.max(jnp.abs(logits_tiled - ref))))

    # Loose sanity vs. full-f32 math (bf16 quantization error only).
    ref_f32 = jnp.maximum(x_flat @ w1_t + b1, 0.0) @ w2_t + b2
    assert jnp.allclose(logits, ref_f32, atol=0.1, rtol=0.1)

    print("KERNEL_OK")
</pallas_src>

<mosaic_0001>
module attributes {stable_mosaic.version = 11 : i64} {
  func.func @mlp_kernel(%arg0: i32, %arg1: memref<16x784xf32, #tpu.memory_space<vmem>>, %arg2: memref<784x128xbf16, #tpu.memory_space<vmem>>, %arg3: memref<1x128xf32, #tpu.memory_space<vmem>>, %arg4: memref<128x10xbf16, #tpu.memory_space<vmem>>, %arg5: memref<1x10xf32, #tpu.memory_space<vmem>>, %arg6: memref<16x10xf32, #tpu.memory_space<vmem>>) attributes {dimension_semantics = [#tpu.dimension_semantics<parallel>], iteration_bounds = array<i64: 4>, scalar_prefetch = 0 : i64, scratch_operands = 0 : i64, tpu.core_type = #tpu.core_type<tc>, window_params = [{transform_indices = @transform_0, window_bounds = array<i64: 16, 784>}, {pipeline_mode = #tpu.pipeline_mode<synchronous>, transform_indices = @transform_1, window_bounds = array<i64: 784, 128>}, {pipeline_mode = #tpu.pipeline_mode<synchronous>, transform_indices = @transform_2, window_bounds = array<i64: 1, 128>}, {pipeline_mode = #tpu.pipeline_mode<synchronous>, transform_indices = @transform_3, window_bounds = array<i64: 128, 10>}, {pipeline_mode = #tpu.pipeline_mode<synchronous>, transform_indices = @transform_4, window_bounds = array<i64: 1, 10>}, {transform_indices = @transform_5, window_bounds = array<i64: 16, 10>}]} {
    %c0 = arith.constant 0 : index
    %c0_0 = arith.constant 0 : index
    %0 = vector.load %arg1[%c0, %c0_0] : memref<16x784xf32, #tpu.memory_space<vmem>>, vector<16x784xf32>
    %1 = arith.truncf %0 : vector<16x784xf32> to vector<16x784xbf16>
    %c0_1 = arith.constant 0 : index
    %c0_2 = arith.constant 0 : index
    %2 = vector.load %arg2[%c0_1, %c0_2] : memref<784x128xbf16, #tpu.memory_space<vmem>>, vector<784x128xbf16>
    %cst = arith.constant dense<0.000000e+00> : vector<16x128xf32>
    %3 = tpu.matmul %1, %2, %cst {dimension_numbers = #tpu.dot_dimension_numbers<[1], [0], [0], [1], [0, 0, 1, 1], [], []>} : vector<16x784xbf16>, vector<784x128xbf16>, vector<16x128xf32> -> vector<16x128xf32>
    %c0_3 = arith.constant 0 : index
    %c0_4 = arith.constant 0 : index
    %4 = vector.load %arg3[%c0_3, %c0_4] : memref<1x128xf32, #tpu.memory_space<vmem>>, vector<1x128xf32>
    %5 = vector.broadcast %4 : vector<1x128xf32> to vector<16x128xf32>
    %6 = arith.addf %3, %5 : vector<16x128xf32>
    %cst_5 = arith.constant 0.000000e+00 : f32
    %7 = vector.broadcast %cst_5 : f32 to vector<16x128xf32>
    %8 = arith.maximumf %6, %7 : vector<16x128xf32>
    %9 = arith.truncf %8 : vector<16x128xf32> to vector<16x128xbf16>
    %c0_6 = arith.constant 0 : index
    %c0_7 = arith.constant 0 : index
    %10 = vector.load %arg4[%c0_6, %c0_7] : memref<128x10xbf16, #tpu.memory_space<vmem>>, vector<128x10xbf16>
    %cst_8 = arith.constant dense<0.000000e+00> : vector<16x10xf32>
    %11 = tpu.matmul %9, %10, %cst_8 {dimension_numbers = #tpu.dot_dimension_numbers<[1], [0], [0], [1], [0, 0, 1, 1], [], []>} : vector<16x128xbf16>, vector<128x10xbf16>, vector<16x10xf32> -> vector<16x10xf32>
    %c0_9 = arith.constant 0 : index
    %c0_10 = arith.constant 0 : index
    %12 = vector.load %arg5[%c0_9, %c0_10] : memref<1x10xf32, #tpu.memory_space<vmem>>, vector<1x10xf32>
    %13 = vector.broadcast %12 : vector<1x10xf32> to vector<16x10xf32>
    %14 = arith.addf %11, %13 : vector<16x10xf32>
    %c0_11 = arith.constant 0 : index
    %c0_12 = arith.constant 0 : index
    %15 = vector.load %arg6[%c0_11, %c0_12] : memref<16x10xf32, #tpu.memory_space<vmem>>, vector<16x10xf32>
    tpu.vector_store %arg6[%c0_11, %c0_12], %14 {strides = array<i32>} : memref<16x10xf32, #tpu.memory_space<vmem>>, vector<16x10xf32>,
    return
  }
  func.func @transform_0(%arg0: i32) -> (i32, i32) {
    %c0_i32 = arith.constant 0 : i32
    %c0_i32_0 = arith.constant 0 : i32
    return %arg0, %c0_i32 : i32, i32
  }
  func.func @transform_1(%arg0: i32) -> (i32, i32) {
    %c0_i32 = arith.constant 0 : i32
    %c0_i32_0 = arith.constant 0 : i32
    %c0_i32_1 = arith.constant 0 : i32
    return %c0_i32, %c0_i32_0 : i32, i32
  }
  func.func @transform_2(%arg0: i32) -> (i32, i32) {
    %c0_i32 = arith.constant 0 : i32
    %c0_i32_0 = arith.constant 0 : i32
    %c0_i32_1 = arith.constant 0 : i32
    return %c0_i32, %c0_i32_0 : i32, i32
  }
  func.func @transform_3(%arg0: i32) -> (i32, i32) {
    %c0_i32 = arith.constant 0 : i32
    %c0_i32_0 = arith.constant 0 : i32
    %c0_i32_1 = arith.constant 0 : i32
    return %c0_i32, %c0_i32_0 : i32, i32
  }
  func.func @transform_4(%arg0: i32) -> (i32, i32) {
    %c0_i32 = arith.constant 0 : i32
    %c0_i32_0 = arith.constant 0 : i32
    %c0_i32_1 = arith.constant 0 : i32
    return %c0_i32, %c0_i32_0 : i32, i32
  }
  func.func @transform_5(%arg0: i32) -> (i32, i32) {
    %c0_i32 = arith.constant 0 : i32
    %c0_i32_0 = arith.constant 0 : i32
    return %arg0, %c0_i32 : i32, i32
  }
}

</mosaic_0001>

<bundles_post_ra>
// kernel: simple_nn_forward.1
= control target key start
LH: loop header
LB: loop body
LE: loop exit
PB: predicated region body
PF: predicated region fallthrough
CT: control target
= control target key end

     0   :  { %s1638_s18 = smov 0   ;;  %s1640_s19 = smov 0   ;;  %s1927_s0 = inlined_call_operand.vmem [shape: f32[56,784], index: 0, kind: input, shape index: {}]   ;;  %s1928_s1 = inlined_call_operand.vmem [shape: bf16[784,128], index: 1, kind: input, shape index: {}]   ;;  %s1929_s2 = inlined_call_operand.vmem [shape: f32[1,128], index: 2, kind: input, shape index: {}]   ;;  %s1930_s3 = inlined_call_operand.vmem [shape: bf16[128,10], index: 3, kind: input, shape index: {}]   ;;  %s1931_s4 = inlined_call_operand.vmem [shape: f32[1,10], index: 4, kind: input, shape index: {}]   ;;  %s1932_s5 = inlined_call_operand.vmem [shape: f32[56,10], index: 5, kind: output, shape index: {}]  }
   0x1   :  { %s1642_s20 = smov 0  }
   0x2 LB: > { %s1651_s21 = sadd.s32 4294967295, %s1572_s20   ;;  %s1653_s22 = sadd.s32 1, %s1572_s20   ;;  %s1572_s20 = sphi %s1642_s20, %s1936_s20   ;;  %s1568_s19 = sphi %s1640_s19, %s1935_s19   ;;  %s1564_s18 = sphi %s1638_s18, %s1934_s18  }
   0x3   : > { %s129_s23 = ssub.s32 %s1572_s20, %s1653_s22  ;;  %s132_s24 = sadd.s32 1, %s1568_s19 }
   0x4   : > { %p130_p0 = scmp.eq.s32.totalorder %s129_s23, 0  ;;  %p142_p1 = scmp.ne.s32.totalorder %s1568_s19, %s1564_s18 }
   0x5   : > { %p143_p2 = scmp.eq.s32.totalorder %s1651_s21, 3  ;;  %p1183_p3 = scmp.ge.s32.totalorder %s1572_s20, 1 }
   0x6   : > { %s1661_s25 = scalar_select %p130_p0, %s1568_s19, %s132_s24  }
   0x7   : > { %p1663_p4 = por %p143_p2, %p142_p1  ;;  %p199_p5 = scmp.lt.s32.totalorder %s1572_s20, 5 }
   0x9   : > { %p200_p6 = pnand %p1183_p3, %p199_p5 }
   0xa   : > { %v1461_v0 = vld [vmem:[%s1928_s1 + $0x40] sm:$0xff] (!%p200_p6)   ;;  %v1465_v4 = vld [vmem:[%s1928_s1 + $0x48] sm:$0xff] (!%p200_p6)   ;;  %v1469_v8 = vld [vmem:[%s1928_s1 + $0x50] sm:$0xff] (!%p200_p6)   ;;  %s1710_s11 = sshll.u32 (!%p200_p6), %s1651_s21, 1  ;;  %v1606_v43 = vmov (!%p200_p6), 0.0   ;;  %vm1607_vm0 = vmmov (!%p200_p6), 0  }
   0xb   : > { %203 = sbr.rel (%p200_p6) target bundleno = 566 (0x236), region = 40  ;;  %v1462_v1 = vld [vmem:[%s1928_s1] sm:$0xff] (!%p200_p6)   ;;  %1267 = vmatprep.subr.bf16.mxu0 (!%p200_p6), %v1461_v0  ;;  %v1466_v5 = vld [vmem:[%s1928_s1 + $0x8] sm:$0xff] (!%p200_p6)   ;;  %v1470_v9 = vld [vmem:[%s1928_s1 + $0x10] sm:$0xff] (!%p200_p6)   ;;  %p238_p7 = scmp.lt.s32.totalorder (!%p200_p6), %s1710_s11, 6  ;;  %vm675_vm1 = vcmask (!%p200_p6), 130048  }
   0xc   : > { %v1463_v2 = vld [vmem:[%s1928_s1 + $0xc0] sm:$0xff] (!%p200_p6)   ;;  %1268 = vmatpush3.bf16.msra.mxu0 (!%p200_p6), %v1462_v1  ;;  %v1467_v6 = vld [vmem:[%s1928_s1 + $0xc8] sm:$0xff] (!%p200_p6)   ;;  %v1471_v10 = vld [vmem:[%s1928_s1 + $0xd0] sm:$0xff] (!%p200_p6)   ;;  %vm958_vm2 = vcmask (!%p200_p6), 80896  }
   0xd   : > { %v1464_v3 = vld [vmem:[%s1928_s1 + $0x80] sm:$0xff] (!%p200_p6)   ;;  %1289 = vmatprep.subr.bf16.mxu1 (!%p200_p6), %v1463_v2  ;;  %1269 = vmatprep.subr.bf16.mxu0 (!%p200_p6), %v1465_v4  ;;  %v1468_v7 = vld [vmem:[%s1928_s1 + $0x88] sm:$0xff] (!%p200_p6)   ;;  %v1472_v11 = vld [vmem:[%s1928_s1 + $0x90] sm:$0xff] (!%p200_p6)  }
   0xe   : > { %1290 = vmatpush3.bf16.msra.mxu1 (!%p200_p6), %v1464_v3  ;;  %v1473_v12 = vld [vmem:[%s1928_s1 + $0x58] sm:$0xff] (!%p200_p6)   ;;  %v1477_v16 = vld [vmem:[%s1928_s1 + $0x60] sm:$0xff] (!%p200_p6)   ;;  %v1481_v20 = vld [vmem:[%s1928_s1 + $0x68] sm:$0xff] (!%p200_p6)  }
   0xf   : > { %1291 = vmatprep.subr.bf16.mxu1 (!%p200_p6), %v1467_v6  ;;  %v1474_v13 = vld [vmem:[%s1928_s1 + $0x18] sm:$0xff] (!%p200_p6)   ;;  %v1478_v17 = vld [vmem:[%s1928_s1 + $0x20] sm:$0xff] (!%p200_p6)   ;;  %v1482_v21 = vld [vmem:[%s1928_s1 + $0x28] sm:$0xff] (!%p200_p6)  }
  0x10   : > { %1270 = vmatpush3.bf16.msra.mxu0 (!%p200_p6), %v1466_v5  ;;  %v1475_v14 = vld [vmem:[%s1928_s1 + $0xd8] sm:$0xff] (!%p200_p6)   ;;  %v1479_v18 = vld [vmem:[%s1928_s1 + $0xe0] sm:$0xff] (!%p200_p6)   ;;  %v1483_v22 = vld [vmem:[%s1928_s1 + $0xe8] sm:$0xff] (!%p200_p6)  }
  0x11   : > { %1271 = vmatprep.subr.bf16.mxu0 (!%p200_p6), %v1469_v8  ;;  %v1476_v15 = vld [vmem:[%s1928_s1 + $0x98] sm:$0xff] (!%p200_p6)   ;;  %v1480_v19 = vld [vmem:[%s1928_s1 + $0xa0] sm:$0xff] (!%p200_p6)   ;;  %v1484_v23 = vld [vmem:[%s1928_s1 + $0xa8] sm:$0xff] (!%p200_p6)  }
  0x12   : > { %1292 = vmatpush3.bf16.msra.mxu1 %v1468_v7  ;;  %s239_s7 = scalar_select %p238_p7, %s1710_s11, 6  ;;  %v1485_v24 = vld [vmem:[%s1928_s1 + $0x70] sm:$0xff]   ;;  %v1489_v28 = vld [vmem:[%s1928_s1 + $0x78] sm:$0xff]   ;;  %v1493_v38 = vld [vmem:[%s1928_s1 + $0x140] sm:$0xff]  }
  0x13   : > { %1293 = vmatprep.subr.bf16.mxu1 %v1471_v10  ;;  %v1486_v25 = vld [vmem:[%s1928_s1 + $0x30] sm:$0xff]   ;;  %v1490_v29 = vld [vmem:[%s1928_s1 + $0x38] sm:$0xff]   ;;  %v1494_v42 = vld [vmem:[%s1928_s1 + $0x100] sm:$0xff]   ;;  %s1264_s28 = sshll.u32 (%p1663_p4), %s1651_s21, 4 }
  0x14   : > { %1272 = vmatpush3.bf16.msra.mxu0 %v1470_v9  ;;  %s1370_s17 = smul.u32 56, %s239_s7  ;;  %v1487_v26 = vld [vmem:[%s1928_s1 + $0xf0] sm:$0xff]   ;;  %v1491_v30 = vld [vmem:[%s1928_s1 + $0xf8] sm:$0xff]   ;;  %v1495_v47 = vld [vmem:[%s1928_s1 + $0x148] sm:$0xff]   ;;  %s1893_s30 = scalar_lea.vmem (%p1663_p4), %s1932_s5, %s1264_s28  }
  0x15   : > { %1273 = vmatprep.subr.bf16.mxu0 %v1473_v12  ;;  %v1488_v27 = vld [vmem:[%s1928_s1 + $0xb0] sm:$0xff]   ;;  %v1492_v34 = vld [vmem:[%s1928_s1 + $0xb8] sm:$0xff]   ;;  %v1496_v48 = vld [vmem:[%s1928_s1 + $0x108] sm:$0xff]  }
  0x16   : > { %1294 = vmatpush3.bf16.msra.mxu1 %v1472_v11  ;;  %s1762_s9 = scalar_lea.vmem %s1927_s0, %s1370_s17  ;;  %v1497_v49 = vld [vmem:[%s1928_s1 + $0x150] sm:$0xff]   ;;  %v1499_v51 = vld [vmem:[%s1928_s1 + $0x158] sm:$0xff]   ;;  %v1501_v53 = vld [vmem:[%s1928_s1 + $0x160] sm:$0xff]   ;;  %s229_s17 = sand.u32 1, %s1564_s18  }
  0x17   : > { %1295 = vmatprep.subr.bf16.mxu1 %v1475_v14  ;;  %v256_v31 = vld [vmem:[%s1762_s9 + $0x8] sm:$0xff]  ;;  %v263_v32 = vld [vmem:[%s1762_s9 + $0x40] sm:$0xff]  ;;  %v262_v36 = vld [vmem:[%s1762_s9 + $0x38] sm:$0xff]  ;;  %s1184_s20 = sshll.u32 %s229_s17, 4  ;;  %s969_s18 = ssub.s32 (%p1663_p4), 7, %s1710_s11 }
  0x18   : > { %1274 = vmatpush3.bf16.msra.mxu0 %v1474_v13  ;;  %v270_v33 = vpack.c.bf16 %v263_v32, %v256_v31  ;;  %v255_v35 = vld [vmem:[%s1762_s9] sm:$0xff]  ;;  %v258_v39 = vld [vmem:[%s1762_s9 + $0x18] sm:$0xff]  ;;  %v265_v40 = vld [vmem:[%s1762_s9 + $0x50] sm:$0xff]  ;;  %s1882_s27 = scalar_lea.vmem [#allocation2], %s1184_s20   ;;  %p970_p8 = scmp.lt.s32.totalorder (%p1663_p4), %s969_s18, 2 }
  0x19   : > { %1275 = vmatprep.subr.bf16.mxu0 %v1477_v16  ;;  %v269_v37 = vpack.c.bf16 %v262_v36, %v255_v35  ;;  %v272_v41 = vpack.c.bf16 %v265_v40, %v258_v39  ;;  %v257_v44 = vld [vmem:[%s1762_s9 + $0x10] sm:$0xff]  ;;  %v264_v45 = vld [vmem:[%s1762_s9 + $0x48] sm:$0xff]  ;;  %v1500_v52 = vld [vmem:[%s1928_s1 + $0x118] sm:$0xff]  }
  0x1a   : > { %1296 = vmatpush3.bf16.msra.mxu1 %v1476_v15  ;;  %711 = vmatprep.mubr.bf16.mxu0 %v270_v33  ;;  %v271_v46 = vpack.c.bf16 %v264_v45, %v257_v44  ;;  %v1498_v50 = vld [vmem:[%s1928_s1 + $0x110] sm:$0xff]   ;;  %v1502_v54 = vld [vmem:[%s1928_s1 + $0x120] sm:$0xff]   ;;  %v1503_v55 = vld [vmem:[%s1928_s1 + $0x168] sm:$0xff]  }
  0x1b   : > { %1297 = vmatprep.subr.bf16.mxu1 %v1479_v18  ;;  %752 = vmatprep.mubr.bf16.mxu1 %v272_v41  ;;  %v1509_v56 = vld [vmem:[%s1928_s1 + $0x180] sm:$0xff]   ;;  %v260_v57 = vld [vmem:[%s1762_s9 + $0x28] sm:$0xff]  ;;  %v1505_v59 = vld [vmem:[%s1928_s1 + $0x170] sm:$0xff]  }
  0x1c   : > { %1276 = vmatpush3.bf16.msra.mxu0 %v1478_v17  ;;  %v1504_v58 = vld [vmem:[%s1928_s1 + $0x128] sm:$0xff]   ;;  %v267_v60 = vld [vmem:[%s1762_s9 + $0x60] sm:$0xff]  ;;  %v261_v62 = vld [vmem:[%s1762_s9 + $0x30] sm:$0xff] }
  0x1d   : > { %1277 = vmatprep.subr.bf16.mxu0 %v1481_v20  ;;  %v274_v61 = vpack.c.bf16 %v267_v60, %v260_v57  ;;  %v268_v63 = vld [vmem:[%s1762_s9 + $0x68] sm:$0xff]  ;;  %v1506_v1 = vld [vmem:[%s1928_s1 + $0x130] sm:$0xff]   ;;  %v1507_v2 = vld [vmem:[%s1928_s1 + $0x178] sm:$0xff]  }
  0x1e   : > { %1298 = vmatpush3.bf16.msra.mxu1 %v1480_v19  ;;  %v275_v0 = vpack.c.bf16 %v268_v63, %v261_v62  ;;  %v1508_v3 = vld [vmem:[%s1928_s1 + $0x138] sm:$0xff]   ;;  %v259_v4 = vld [vmem:[%s1762_s9 + $0x20] sm:$0xff]  ;;  %v1511_v8 = vld [vmem:[%s1930_s3 + $0x8] sm:$0xff]  }
  0x1f   : > { %1299 = vmatprep.subr.bf16.mxu1 %v1483_v22  ;;  %v266_v5 = vld [vmem:[%s1762_s9 + $0x58] sm:$0xff]  ;;  %v1510_v7 = vld [vmem:[%s1930_s3] sm:$0xff]   ;;  %v1512_v9 = vld [vmem:[%s1930_s3 + $0x10] sm:$0xff]  }
  0x20   : > { %1278 = vmatpush3.bf16.msra.mxu0 %v1482_v21  ;;  %v273_v6 = vpack.c.bf16 %v266_v5, %v259_v4  ;;  %v1513_v10 = vld [vmem:[%s1930_s3 + $0x18] sm:$0xff]   ;;  %v1514_v11 = vld [vmem:[%s1930_s3 + $0x20] sm:$0xff]   ;;  %v1515_v12 = vld [vmem:[%s1930_s3 + $0x28] sm:$0xff]  }
  0x21   : > { %1279 = vmatprep.subr.bf16.mxu0 %v1485_v24  ;;  %v1516_v13 = vld [vmem:[%s1930_s3 + $0x30] sm:$0xff]   ;;  %v1517_v14 = vld [vmem:[%s1930_s3 + $0x38] sm:$0xff]   ;;  %v1187_v16 = vld [vmem:[%s1929_s2] ss:$0 sm:$0xff] }
  0x22   : > { %1300 = vmatpush3.bf16.msra.mxu1 %v1484_v23 }
  0x23   : > { %1301 = vmatprep.subr.bf16.mxu1 %v1487_v26 }
  0x24   : > { %1280 = vmatpush3.bf16.msra.mxu0 %v1486_v25 }
  0x25   : > { %1281 = vmatprep.subr.bf16.mxu0 %v1489_v28 }
  0x26   : > { %1302 = vmatpush3.bf16.msra.mxu1 %v1488_v27 }
  0x27   : > { %1303 = vmatprep.subr.bf16.mxu1 %v1491_v30 }
  0x28   : > { %1282 = vmatpush3.bf16.msra.mxu0 %v1490_v29 }
  0x29   : > { %1311 = vmatprep.subr.bf16.mxu0 %v1493_v38 }
  0x2a   : > { %1304 = vmatpush3.bf16.msra.mxu1 %v1492_v34 }
  0x2b   : > { %1344 = vmatprep.subr.bf16.mxu1 %v1606_v43  ;;  %712 = vmatmul.mubr.bf16.vlgmr.msra.gmra.mrb[0].mxu0 %v269_v37 }
  0x2c   : > { %1312 = vmatpush3.bf16.msra.mxu0 %v1494_v42  ;;  %793 = vmatprep.mubr.bf16.mxu0 %v274_v61 }
  0x2d   : > { %753 = vmatmul.mubr.bf16.vlgmr.msra.gmra.mrb[0].mxu1 %v271_v46  ;;  %1313 = vmatprep.subr.bf16.mxu0 %v1495_v47 }
  0x2e   : > { %1346 = vmatprep.mubr.msk.bf16.mxu1 %vm1607_vm0, %v1606_v43  ;;  %1345 = vmatpush3.bf16.msra.mxu1 %v1509_v56 }
  0x2f   : > { %1350 = vmatprep.subr.bf16.mxu1 %v1606_v43 }
  0x30   : > { %1314 = vmatpush3.bf16.msra.mxu0 %v1496_v48 }
  0x31   : > { %1315 = vmatprep.subr.bf16.mxu0 %v1497_v49  ;;  %v1238_v49 = vld [vmem:[%s1931_s4] ss:$0 sm:$0xff] }
  0x34   : > { %1316 = vmatpush3.bf16.msra.mxu0 %v1498_v50 }
  0x35   : > { %1317 = vmatprep.subr.bf16.mxu0 %v1499_v51  ;;  %1347 = vmatmul.mubr.msk.bf16.vlgmr.msra.gmra.mrb[4].mxu1 %vm675_vm1, %v275_v0 }
  0x36   : > { %1366 = vmatprep.mubr.msk.bf16.mxu1 %vm1607_vm0, %v1606_v43  ;;  %1351 = vmatpush3.bf16.msra.mxu1 %v1510_v7 }
  0x37   : > { %1352 = vmatprep.subr.bf16.mxu1 %v1606_v43 }
  0x38   : > { %1318 = vmatpush3.bf16.msra.mxu0 %v1500_v52 }
  0x39   : > { %1319 = vmatprep.subr.bf16.mxu0 %v1501_v53 }
  0x3a   : > { %1353 = vmatpush3.bf16.msra.mxu1 %v1511_v8 }
  0x3b   : > { %1354 = vmatprep.subr.bf16.mxu1 %v1606_v43 }
  0x3c   : > { %1320 = vmatpush3.bf16.msra.mxu0 %v1502_v54 }
  0x3d   : > { %1321 = vmatprep.subr.bf16.mxu0 %v1503_v55 }
  0x3e   : > { %1355 = vmatpush3.bf16.msra.mxu1 %v1512_v9 }
  0x3f   : > { %1356 = vmatprep.subr.bf16.mxu1 %v1606_v43 }
  0x40   : > { %1322 = vmatpush3.bf16.msra.mxu0 %v1504_v58 }
  0x41   : > { %1323 = vmatprep.subr.bf16.mxu0 %v1505_v59 }
  0x42   : > { %1357 = vmatpush3.bf16.msra.mxu1 %v1513_v10 }
  0x43   : > { %1358 = vmatprep.subr.bf16.mxu1 %v1606_v43 }
  0x44   : > { %1324 = vmatpush3.bf16.msra.mxu0 %v1506_v1 }
  0x45   : > { %1325 = vmatprep.subr.bf16.mxu0 %v1507_v2 }
  0x46   : > { %1359 = vmatpush3.bf16.msra.mxu1 %v1514_v11 }
  0x47   : > { %1360 = vmatprep.subr.bf16.mxu1 %v1606_v43 }
  0x48   : > { %1326 = vmatpush3.bf16.msra.mxu0 %v1508_v3 }
  0x4a   : > { %1361 = vmatpush3.bf16.msra.mxu1 %v1515_v12 }
  0x4b   : > { %794 = vmatmul.mubr.bf16.vlgmr.msra.gmra.mrb[4].mxu0 %v273_v6  ;;  %1362 = vmatprep.subr.bf16.mxu1 %v1606_v43 }
  0x4e   : > { %1363 = vmatpush3.bf16.msra.mxu1 %v1516_v13 }
  0x4f   : > { %1364 = vmatprep.subr.bf16.mxu1 %v1606_v43 }
  0x52   : > { %1365 = vmatpush3.bf16.msra.mxu1 %v1517_v14 }
  0xfe   : > { %v1283_v15 = vpop.f32.mrb[0].mxu0 }
  0xff   : > { %v1284_v17 = vpop.f32.mrb[1].mxu0 }
 0x100   : > { %v1285_v18 = vadd.f32 %v1284_v17, %v1283_v15  ;;  %v1286_v19 = vpop.f32.mrb[2].mxu0  ;;  %v1305_v20 = vpop.f32.mrb[0].mxu1 }
 0x101   : > { %v1287_v21 = vpop.f32.mrb[3].mxu0  ;;  %v1306_v24 = vpop.f32.mrb[1].mxu1 }
 0x102   : > { %v714_v22 = vadd.f32 %v1285_v18, %v1187_v16  ;;  %v1288_v23 = vadd.f32 %v1287_v21, %v1286_v19  ;;  %v1307_v25 = vadd.f32 %v1306_v24, %v1305_v20  ;;  %v1308_v26 = vpop.f32.mrb[2].mxu1 }
 0x103   : > { %v1309_v28 = vpop.f32.mrb[3].mxu1 }
 0x104   : > { %v717_v27 = vadd.f32 %v1288_v23, %v1187_v16  ;;  %v755_v29 = vadd.f32 %v1307_v25, %v714_v22  ;;  %v1310_v30 = vadd.f32 %v1309_v28, %v1308_v26 }
 0x106   : > { %v758_v31 = vadd.f32 %v1310_v30, %v717_v27 }
 0x108   : > { %v836_v32 = vpop.f32.mrb[4].mxu1 }
 0x109   : > { %v1348_v33 = vpop.f32.mrb[5].mxu1 }
 0x10a   : > { %v839_v34 = vpop.f32.mrb[6].mxu1 }
 0x10b   : > { %v1349_v35 = vpop.f32.mrb[7].mxu1 }
 0x11e   : > { %v1327_v36 = vpop.f32.mrb[4].mxu0 }
 0x11f   : > { %v1328_v37 = vpop.f32.mrb[5].mxu0 }
 0x120   : > { %v1329_v38 = vadd.f32 %v1328_v37, %v1327_v36  ;;  %v1330_v39 = vpop.f32.mrb[6].mxu0 }
 0x121   : > { %v1331_v40 = vpop.f32.mrb[7].mxu0 }
 0x122   : > { %v796_v41 = vadd.f32 %v1329_v38, %v755_v29  ;;  %v1332_v42 = vadd.f32 %v1331_v40, %v1330_v39 }
 0x124   : > { %v837_v43 = vadd.f32 %v836_v32, %v796_v41  ;;  %v799_v44 = vadd.f32 %v1332_v42, %v758_v31 }
 0x126   : > { %v840_v45 = vadd.f32 %v839_v34, %v799_v44  ;;  %v843_v46 = vmax.f32 %v837_v43, 0.0 }
 0x128   : > { %v844_v47 = vmax.f32 %v840_v45, 0.0 }
 0x12a   : > { %v845_v48 = vpack.c.bf16 %v844_v47, %v843_v46 }
 0x12c   : > { %1367 = vmatmul.mubr.bf16.vlgmr.msra.gmra.mrb[8].mxu1 %v845_v48 }
 0x1fe   : > { %967 = sbr.rel (!%p1663_p4) target bundleno = 566 (0x236), region = 44 }
 0x1ff   : > { %v951_v50 = vpop.f32.mrb[8].mxu1 }
 0x200   : > { %v952_v51 = vadd.f32 %v1238_v49, %v951_v50  ;;  %v1368_v52 = vpop.f32.mrb[9].mxu1 }
 0x201   : > { %v954_v53 = vpop.f32.mrb[10].mxu1 }
 0x202   : > { %959 = vst.msk [vmem:[%s1882_s27] sm:$0xff] %vm958_vm2, %v952_v51  ;;  %v955_v54 = vadd.f32 %v1238_v49, %v954_v53  ;;  %v1369_v55 = vpop.f32.mrb[11].mxu1 }
 0x204   : > { %960 = vst.msk [vmem:[%s1882_s27 + $0x8] sm:$0xff] %vm958_vm2, %v955_v54 }
 0x205   : > { %s1938_s18 = smov (!%p970_p8, %s969_s18), 2 }
 0x206   : > { %s1249_s6 = sshll.u32 %s1938_s18, 7 }
 0x207   : > { %p1252_p9 = scmp.eq.s32.totalorder %s1249_s6, 0 }
 0x208   : > { %s1899_s7 = sshrl.u32 (!%p1252_p9), %s1938_s18, 1 }
 0x209   : > { %978 = sbr.rel (%p1252_p9) target bundleno = 566 (0x236), region = 48  ;;  %p1253_p10 = scmp.le.s32.totalorder (!%p1252_p9), %s1899_s7, 0 }
 0x210   : > { %1136 = sbr.rel (%p1253_p10) target bundleno = 545 (0x221), region = 124  ;;  %s1574_s21 = smov (!%p1253_p10), %s1893_s30  }
 0x211   : > { %s1578_s26 = smov (!%p1253_p10), %s1882_s27   ;;  %s1582_s11 = smov (!%p1253_p10), 0  }
 0x212   : > { %s1586_s8 = smov (!%p1253_p10), 0  }
 0x217 LB: >> { %v1042_v56 = vld [vmem:[%s1580_s26] sm:$0xff]  ;;  %v1044_v57 = vld [vmem:[%s1580_s26 + $0x8] sm:$0xff]  ;;  %s1046_s10 = sadd.s32 1, %s1584_s11  ;;  %s1036_s8 = sadd.s32 1, %s1588_s8   ;;  %s1588_s8 = sphi %s1586_s8, %s1036_s8   ;;  %s1584_s11 = sphi %s1582_s11, %s1583_s11   ;;  %s1580_s26 = sphi %s1578_s26, %s1051_s26   ;;  %s1576_s21 = sphi %s1574_s21, %s1052_s21  }
 0x218   : >> { %1043 = vst [vmem:[%s1576_s21] sm:$0xff] %v1042_v56  ;;  %1045 = vst [vmem:[%s1576_s21 + $0x8] sm:$0xff] %v1044_v57  ;;  %p1047_p11 = scmp.ge.s32.totalorder %s1046_s10, %s1899_s7  ;;  %p1035_p12 = scmp.ge.s32.totalorder %s1036_s8, %s1899_s7 }
 0x21a   : >> { %s1940_s10 = smov (%p1047_p11, %s1046_s10), 0  ;;  %1038 = sbr.rel (!%p1035_p12) target bundleno = 535 (0x217), region = 130 }
 0x21b   : >> { %s1254_s12 = sshll.u32 %s1940_s10, 4  ;;  %s1583_s11 = smov %s1940_s10  }
 0x21c   : >> { %s1051_s26 = scalar_lea.vmem %s1882_s27, %s1254_s12 [#allocation2]   ;;  %s1052_s21 = scalar_lea.vmem %s1893_s30, %s1254_s12  }
 0x221 PF: > { %s1909_s13 = sand.u32 1, %s1938_s18   ;;  %s1265_s14 = sshll.u32 %s1899_s7, 4 }
 0x222   : > { %s1057_s15 = scalar_lea.vmem %s1882_s27, %s1265_s14 [#allocation2]   ;;  %s1059_s16 = scalar_lea.vmem %s1893_s30, %s1265_s14  }
 0x223   : > { %p1259_p13 = scmp.le.s32.totalorder %s1909_s13, 0 }
 0x224   : > { %s1590_s17 = smov (!%p1259_p13), %s1059_s16   ;;  %s1594_s20 = smov (!%p1259_p13), %s1057_s15  }
 0x225   : > { %1150 = sbr.rel (%p1259_p13) target bundleno = 566 (0x236), region = 135  ;;  %s1598_s23 = smov (!%p1259_p13), 0  }
 0x226   : > { %s1602_s24 = smov (!%p1259_p13), 0  }
 0x22c LB: >> { %v1069_v58 = vld [vmem:[%s1596_s20] sm:$0xff]  ;;  %s1071_s18 = sadd.s32 1, %s1600_s23  ;;  %s1063_s24 = sadd.s32 1, %s1604_s24   ;;  %s1604_s24 = sphi %s1602_s24, %s1063_s24   ;;  %s1600_s23 = sphi %s1598_s23, %s1599_s23   ;;  %s1596_s20 = sphi %s1594_s20, %s1076_s20   ;;  %s1592_s17 = sphi %s1590_s17, %s1077_s17  }
 0x22d   : >> { %1070 = vst [vmem:[%s1592_s17] sm:$0xff] %v1069_v58  ;;  %p1072_p0 = scmp.ge.s32.totalorder %s1071_s18, %s1909_s13  ;;  %p1062_p1 = scmp.ge.s32.totalorder %s1063_s24, %s1909_s13 }
 0x22f   : >> { %s1942_s18 = smov (%p1072_p0, %s1071_s18), 0  ;;  %1065 = sbr.rel (!%p1062_p1) target bundleno = 556 (0x22c), region = 141 }
 0x230   : >> { %s1260_s27 = sshll.u32 %s1942_s18, 3  ;;  %s1599_s23 = smov %s1942_s18  }
 0x231   : >> { %s1076_s20 = scalar_lea.vmem %s1057_s15, %s1260_s27 [#allocation2]   ;;  %s1077_s17 = scalar_lea.vmem %s1059_s16, %s1260_s27  }
 0x236 PF: > { %p12_p2 = scmp.ge.s32.totalorder %s1653_s22, 6   ;;  %s1934_s18 = smov %s1568_s19 }
 0x237   : > { %s1935_s19 = smov %s1661_s25  ;;  %s1936_s20 = smov %s1653_s22 }
 0x238   :  { %14 = sbr.rel (!%p12_p2) target bundleno = 2 (0x2), region = 152 }

</bundles_post_ra>
